<compile_context>
chip_gen: v7x
topology: tpu7x:2x2x1
jax: 0.10.0
libtpu: 0.0.40
codegen_flags: <defaults>
</compile_context>

<pallas_src>
import functools

import jax
import jax.numpy as jnp
from jax import lax
from jax.experimental import pallas as pl
from jax.experimental.pallas import tpu as pltpu


# --------------------------- per-generation budgets --------------------------

_MIB = 1024 * 1024


def _detect_vmem_capacity_bytes():
    """Physical VMEM per core (v5e/v6e: 128 MiB, v7x: 64 MiB)."""
    try:
        info = pltpu.get_tpu_info()
        for attr in ("vmem_capacity_bytes", "vmem_bytes", "vmem_size_bytes"):
            cap = getattr(info, attr, None)
            if cap:
                return int(cap)
    except Exception:
        pass
    return 64 * _MIB  # conservative default (v7x has the smallest VMEM)


_VMEM_CAP = _detect_vmem_capacity_bytes()
# Scoped-VMEM limit handed to Mosaic: half of physical (64 MiB on v5e/v6e,
# 32 MiB on v7x) -- leaves headroom for double buffering.
_VMEM_LIMIT = int(min(max(_VMEM_CAP // 2, 32 * _MIB), 96 * _MIB))
_GEMM_TILE_CAP = 512
_ATTN_TILE_CAP = 512 if _VMEM_CAP >= 100 * _MIB else 256
_ATTN_VMEM_BUDGET = int(min(max(_VMEM_CAP // 5, 8 * _MIB), 32 * _MIB))
_KV_BUFFERS = 3 if _VMEM_CAP >= 100 * _MIB else 2


# --------------------------------- helpers ----------------------------------

def _round_up(x, m):
    return ((x + m - 1) // m) * m


def _pick_tile_aligned(dim, cap, align):
    """Largest multiple of `align` that divides `dim` and is <= cap, or None."""
    best = None
    top = min(cap, dim)
    for t in range(align, top + 1, align):
        if dim % t == 0:
            best = t
    return best


def _tile_and_pad(dim, cap, align):
    """(tile, padded_dim): tile respects the Mosaic (8,128) block-shape rule
    (multiple of `align` or the full dim) and divides padded_dim.  Awkward dims
    are zero-padded instead of falling back to one oversized block."""
    if dim <= cap:
        return dim, dim          # single full-dim block is always legal
    t = _pick_tile_aligned(dim, cap, align)
    if t is not None:
        return t, dim
    t = max(align, (cap // align) * align)
    return t, _round_up(dim, t)


def _pick_divisor(dim, cap, prefer=()):
    """Largest divisor of `dim` <= cap, preferring the given alignments."""
    cap = max(1, min(cap, dim))
    for align in tuple(prefer) + (1,):
        best = 0
        for t in range(align, cap + 1, align):
            if dim % t == 0:
                best = t
        if best:
            return best
    return 1
    # TODO(synk): prime/ragged seq lengths > cap degrade to tiny tiles; a
    # padded + masked kv path would be needed to tile those efficiently.


def _maybe_buffered_spec(block_shape, index_map, n_buffers):
    """BlockSpec, with deeper multi-buffering for streamed inputs when asked."""
    if n_buffers > 2 and hasattr(pl, "Buffered"):
        try:
            return pl.BlockSpec(block_shape, index_map,
                                pipeline_mode=pl.Buffered(n_buffers))
        except TypeError:  # older BlockSpec signature without pipeline_mode
            pass
    return pl.BlockSpec(block_shape, index_map)


# ----------------------------- Pallas kernels ------------------------------

def _matmul_kernel(x_ref, w_ref, o_ref, acc_ref):
    @pl.when(pl.program_id(2) == 0)
    def _():
        acc_ref[...] = jnp.zeros(acc_ref.shape, acc_ref.dtype)

    # bf16 operands feed the MXU at its native rate; accumulate in f32.
    acc_ref[...] += jnp.dot(
        x_ref[...].astype(jnp.bfloat16),
        w_ref[...].astype(jnp.bfloat16),
        preferred_element_type=jnp.float32,
    )

    @pl.when(pl.program_id(2) == pl.num_programs(2) - 1)
    def _():
        o_ref[...] = acc_ref[...].astype(o_ref.dtype)


def _matmul_bias_kernel(x_ref, w_ref, b_ref, o_ref, acc_ref):
    @pl.when(pl.program_id(2) == 0)
    def _():
        acc_ref[...] = jnp.zeros(acc_ref.shape, acc_ref.dtype)

    acc_ref[...] += jnp.dot(
        x_ref[...].astype(jnp.bfloat16),
        w_ref[...].astype(jnp.bfloat16),
        preferred_element_type=jnp.float32,
    )

    @pl.when(pl.program_id(2) == pl.num_programs(2) - 1)
    def _():
        o_ref[...] = (acc_ref[...] + b_ref[...].astype(jnp.float32)).astype(
            o_ref.dtype
        )


def _flash_attn_kernel(q_ref, k_ref, v_ref, o_ref, m_sc, l_sc, acc_sc, *, h_blk):
    """Blocks: q/o (1, tq, h_blk, d); k/v (1, tk, h_blk, d).  The softmax scale
    is pre-folded into the q-projection weights.  Heads are a static unroll."""
    kv = pl.program_id(3)

    @pl.when(kv == 0)
    def _():
        m_sc[...] = jnp.full(m_sc.shape, -jnp.inf, m_sc.dtype)
        l_sc[...] = jnp.zeros(l_sc.shape, l_sc.dtype)
        acc_sc[...] = jnp.zeros(acc_sc.shape, acc_sc.dtype)

    for hh in range(h_blk):  # static unroll over the heads in this block
        q = q_ref[0, :, hh, :].astype(jnp.bfloat16)   # (tq, d)
        k = k_ref[0, :, hh, :].astype(jnp.bfloat16)   # (tk, d)

        # scores (tq, tk): contract the d dims directly (no k transpose).
        s = lax.dot_general(
            q, k,
            dimension_numbers=(((1,), (1,)), ((), ())),
            preferred_element_type=jnp.float32,
        )

        m_prev = m_sc[hh]                                   # (tq, 1)
        m_new = jnp.maximum(m_prev, jnp.max(s, axis=-1, keepdims=True))
        alpha = jnp.exp(m_prev - m_new)   # exp(-inf) == 0 on the first kv step
        p = jnp.exp(s - m_new)            # f32 softmax statistics (numerics)

        l_sc[hh] = alpha * l_sc[hh] + jnp.sum(p, axis=-1, keepdims=True)
        v = v_ref[0, :, hh, :].astype(jnp.bfloat16)         # (tk, d)
        acc_sc[hh] = alpha * acc_sc[hh] + lax.dot_general(
            p.astype(jnp.bfloat16), v,
            dimension_numbers=(((1,), (0,)), ((), ())),
            preferred_element_type=jnp.float32,
        )
        m_sc[hh] = m_new

    @pl.when(kv == pl.num_programs(3) - 1)
    def _():
        for hh in range(h_blk):
            inv = pl.reciprocal(l_sc[hh], approx=True)      # EUP, once per tile
            o_ref[0, :, hh, :] = (acc_sc[hh] * inv).astype(o_ref.dtype)


# ----------------------------- Python wrappers ------------------------------

def linear(x2d, w, bias=None, *, out_dtype=None, tm_cap=None, tn_cap=None,
           tk_cap=None):
    """x2d: (M, K) @ w: (K, N) (+ bias (N,)) -> (M, N), tiled + pipelined.

    Operands are cast to bf16 in-kernel; accumulation is f32.  Awkward shapes
    are zero-padded up to aligned tiles (exact) so the double-buffered
    footprint always respects the scoped-VMEM limit."""
    M, K = x2d.shape
    K2, N = w.shape
    assert K == K2, (K, K2)
    out_dtype = out_dtype or x2d.dtype
    tm_cap = tm_cap or _GEMM_TILE_CAP
    tn_cap = tn_cap or _GEMM_TILE_CAP
    tk_cap = tk_cap or _GEMM_TILE_CAP

    tm, Mp = _tile_and_pad(M, tm_cap, 8)
    tk, Kp = _tile_and_pad(K, tk_cap, 128)
    tn, Np = _tile_and_pad(N, tn_cap, 128)

    # v7x megacore: keep >= 2 blocks on a "parallel" axis so both TensorCores
    # get work even when M*N fits a single block.
    if Mp // tm == 1 and Np // tn == 1 and Mp % 8 == 0 and Mp >= 16:
        t2 = _pick_tile_aligned(Mp, Mp // 2, 8)
        if t2:
            tm = t2

    if (Mp, Kp) != (M, K):
        x2d = jnp.pad(x2d, ((0, Mp - M), (0, Kp - K)))
    if (Kp, Np) != (K, N):
        w = jnp.pad(w, ((0, Kp - K), (0, Np - N)))

    grid = (Mp // tm, Np // tn, Kp // tk)

    cost = pl.CostEstimate(
        flops=2 * Mp * Np * Kp,
        transcendentals=0,
        bytes_accessed=int(Mp * Kp * x2d.dtype.itemsize
                           + Kp * Np * w.dtype.itemsize
                           + Mp * Np * jnp.dtype(out_dtype).itemsize),
    )
    cparams = pltpu.CompilerParams(
        dimension_semantics=("parallel", "parallel", "arbitrary"),
        vmem_limit_bytes=_VMEM_LIMIT,
    )
    x_spec = pl.BlockSpec((tm, tk), lambda i, j, kk: (i, kk))
    w_spec = pl.BlockSpec((tk, tn), lambda i, j, kk: (kk, j))
    o_spec = pl.BlockSpec((tm, tn), lambda i, j, kk: (i, j))
    scratch = [pltpu.VMEM((tm, tn), jnp.float32)]
    out_shape = jax.ShapeDtypeStruct((Mp, Np), out_dtype)

    if bias is None:
        out = pl.pallas_call(
            _matmul_kernel,
            out_shape=out_shape, grid=grid,
            in_specs=[x_spec, w_spec], out_specs=o_spec,
            scratch_shapes=scratch, compiler_params=cparams, cost_estimate=cost,
        )(x2d, w)
    else:
        b2d = bias.astype(jnp.float32).reshape(1, N)
        if Np != N:
            b2d = jnp.pad(b2d, ((0, 0), (0, Np - N)))
        b_spec = pl.BlockSpec((1, tn), lambda i, j, kk: (0, j))
        out = pl.pallas_call(
            _matmul_bias_kernel,
            out_shape=out_shape, grid=grid,
            in_specs=[x_spec, w_spec, b_spec], out_specs=o_spec,
            scratch_shapes=scratch, compiler_params=cparams, cost_estimate=cost,
        )(x2d, w, b2d)

    if (Mp, Np) != (M, N):
        out = out[:M, :N]
    return out


def mha_core(q, k, v, *, tq_cap=None, tk_cap=None, vmem_budget=None,
             kv_buffers=None):
    """q: (b, n, h, d); k, v: (b, nk, h, d) -> (b, n, h, d).

    Consumes the projections' natural (b, seq, h, d) layout directly (no HBM
    transposes) and writes the output in the same layout.  Scale must already
    be folded into q."""
    b, n, h, dh = q.shape
    bk, nk, hk, dk = k.shape
    assert (bk, hk, dk) == (b, h, dh), "batch/heads/dim_head must match q"
    assert v.shape == k.shape

    tq_cap = tq_cap or _ATTN_TILE_CAP
    tk_cap = tk_cap or _ATTN_TILE_CAP
    vmem_budget = vmem_budget or _ATTN_VMEM_BUDGET
    kv_buffers = kv_buffers or _KV_BUFFERS

    itemsize = q.dtype.itemsize
    lane = _round_up(dh, 128)

    # Head blocks must keep the block's trailing (h_blk, dh) dims legal:
    # h_blk % 8 == 0 or h_blk == h (full).
    hb_cands = [d for d in range(h, 0, -1)
                if h % d == 0 and (d % 8 == 0 or d == h)]

    def footprint(hb, tq, tk, nbuf):
        sub = _round_up(hb, 8)
        tile_q = tq * sub * lane * itemsize
        tile_k = tk * sub * lane * itemsize
        total = 2 * 2 * tile_q                               # q + o, dbl-buffered
        total += 2 * nbuf * tile_k                           # k + v
        total += hb * _round_up(tq, 8) * lane * 4            # f32 accumulator
        total += 2 * hb * _round_up(tq, 8) * 128 * 4         # f32 running max/sum
        total += 3 * _round_up(tq, 8) * _round_up(tk, 128) * 4   # score temps
        return total

    tq = tk = h_blk = None
    cq, ck = tq_cap, tk_cap
    for _ in range(6):
        tq = _pick_divisor(n, cq, prefer=(8,))
        tk = _pick_divisor(nk, ck, prefer=(128, 8))   # 128-lane aligned kv tiles
        nbuf = kv_buffers if (nk // tk) > 2 else 2
        h_blk = next((hb for hb in hb_cands
                      if footprint(hb, tq, tk, nbuf) <= vmem_budget), None)
        if h_blk is not None:
            break
        cq, ck = max(8, cq // 2), max(8, ck // 2)
    if h_blk is None:
        h_blk = hb_cands[-1]       # smallest legal head block; accept footprint
    nbuf = kv_buffers if (nk // tk) > 2 else 2

    grid = (b, h // h_blk, n // tq, nk // tk)

    q_map = lambda bi, hi, qi, ki: (bi, qi, hi, 0)
    kv_map = lambda bi, hi, qi, ki: (bi, ki, hi, 0)

    q_spec = pl.BlockSpec((1, tq, h_blk, dh), q_map)
    k_spec = _maybe_buffered_spec((1, tk, h_blk, dh), kv_map, nbuf)
    v_spec = _maybe_buffered_spec((1, tk, h_blk, dh), kv_map, nbuf)
    o_spec = pl.BlockSpec((1, tq, h_blk, dh), q_map)

    cost = pl.CostEstimate(
        flops=4 * b * h * n * nk * dh,
        transcendentals=b * h * n * nk,
        bytes_accessed=int((2 * q.size + (k.size + v.size) * max(1, n // tq))
                           * itemsize),
    )

    return pl.pallas_call(
        functools.partial(_flash_attn_kernel, h_blk=h_blk),
        out_shape=jax.ShapeDtypeStruct((b, n, h, dh), q.dtype),
        grid=grid,
        in_specs=[q_spec, k_spec, v_spec],
        out_specs=o_spec,
        scratch_shapes=[
            pltpu.VMEM((h_blk, tq, 1), jnp.float32),    # running max
            pltpu.VMEM((h_blk, tq, 1), jnp.float32),    # running sum
            pltpu.VMEM((h_blk, tq, dh), jnp.float32),   # output accumulator
        ],
        compiler_params=pltpu.CompilerParams(
            dimension_semantics=("parallel", "parallel", "parallel", "arbitrary"),
            vmem_limit_bytes=_VMEM_LIMIT,
        ),
        cost_estimate=cost,
    )(q, k, v)


class AttentionQKV:
    """JAX/Pallas port of the PyTorch Attention_qkv module."""

    def __init__(self, dim, heads=8, dim_head=64, dropout=0.0, key=None):
        inner_dim = dim_head * heads
        self.dim = dim
        self.heads = heads
        self.dim_head = dim_head
        self.inner_dim = inner_dim
        self.scale = dim_head ** (-0.5)
        self.project_out = not (heads == 1 and dim_head == dim)
        # dropout == 0.0 -> identity.
        # TODO(synk): training-mode dropout masking is not implemented.

        if key is None:
            key = jax.random.PRNGKey(0)
        kq, kk, kv, ko, kb = jax.random.split(key, 5)
        # PyTorch Linear weights are (out, in); store pre-transposed (in, out).
        s_in = 1.0 / (dim ** 0.5)
        self.w_q = jax.random.uniform(kq, (dim, inner_dim), jnp.float32, -s_in, s_in)
        self.w_k = jax.random.uniform(kk, (dim, inner_dim), jnp.float32, -s_in, s_in)
        self.w_v = jax.random.uniform(kv, (dim, inner_dim), jnp.float32, -s_in, s_in)
        if self.project_out:
            s_out = 1.0 / (inner_dim ** 0.5)
            self.w_o = jax.random.uniform(ko, (inner_dim, dim), jnp.float32, -s_out, s_out)
            self.b_o = jax.random.uniform(kb, (dim,), jnp.float32, -s_out, s_out)
        else:
            self.w_o = None
            self.b_o = None

        # bf16 device copies fed to the kernels (MXU-native operands, half the
        # weight DMA bytes).  The softmax scale is folded into w_q in f32 once
        # here, so the attention kernel never re-scales q.
        self._w_q_dev = (self.w_q * self.scale).astype(jnp.bfloat16)
        self._w_k_dev = self.w_k.astype(jnp.bfloat16)
        self._w_v_dev = self.w_v.astype(jnp.bfloat16)
        self._w_o_dev = self.w_o.astype(jnp.bfloat16) if self.project_out else None

    def __call__(self, q, k, v):
        b, n, _ = q.shape
        bk, nk, _ = k.shape
        h, dh = self.heads, self.dim_head

        # Projections (tiled Pallas GEMMs, bf16 operands, f32 accumulation).
        # Intermediates kept in bf16: halves HBM traffic into attention.
        # TODO(synk): when q is k is v, fuse the three projections into one GEMM
        # over concatenated weights (needs a fused-layout attention input path).
        q_p = linear(q.reshape(b * n, self.dim), self._w_q_dev, out_dtype=jnp.bfloat16)
        k_p = linear(k.reshape(bk * nk, self.dim), self._w_k_dev, out_dtype=jnp.bfloat16)
        v_p = linear(v.reshape(bk * nk, self.dim), self._w_v_dev, out_dtype=jnp.bfloat16)

        # 'b n (h d) -> b n h d' is a free reshape (no HBM transpose).  The
        # attention kernel indexes heads via its BlockSpec + static per-head
        # slices, and writes its output in the same layout, so the old
        # 'b h n d' transpose round-trips are eliminated.
        q4 = q_p.reshape(b, n, h, dh)
        k4 = k_p.reshape(bk, nk, h, dh)
        v4 = v_p.reshape(bk, nk, h, dh)

        out = mha_core(q4, k4, v4).reshape(b, n, self.inner_dim)

        if self.project_out:
            out = linear(out.reshape(b * n, self.inner_dim), self._w_o_dev,
                         self.b_o, out_dtype=jnp.float32)
            out = out.reshape(b, n, self.dim)
        else:
            out = out.astype(jnp.float32)
        return out


# ------------------------------- references --------------------------------

def _reference(mod, q, k, v):
    """Pure-JAX f32 reference matching the PyTorch forward exactly."""
    b, n, _ = q.shape
    bk, nk, _ = k.shape
    h, dh = mod.heads, mod.dim_head
    qp = (q @ mod.w_q).reshape(b, n, h, dh).transpose(0, 2, 1, 3)
    kp = (k @ mod.w_k).reshape(bk, nk, h, dh).transpose(0, 2, 1, 3)
    vp = (v @ mod.w_v).reshape(bk, nk, h, dh).transpose(0, 2, 1, 3)
    dots = jnp.einsum('bhid,bhjd->bhij', qp, kp) * mod.scale
    attn = jax.nn.softmax(dots, axis=-1)
    out = jnp.einsum('bhij,bhjd->bhid', attn, vp)
    out = out.transpose(0, 2, 1, 3).reshape(b, n, mod.inner_dim)
    if mod.project_out:
        out = out @ mod.w_o + mod.b_o
    return out


def _sdpa_reference(q, k, v, scale):
    """q: (b, n, h, d); k/v: (b, nk, h, d)."""
    s = jnp.einsum('bqhd,bkhd->bhqk', q, k) * scale
    p = jax.nn.softmax(s, axis=-1)
    return jnp.einsum('bhqk,bkhd->bqhd', p, v)


if __name__ == "__main__":
    key = jax.random.PRNGKey(0)
    keys = jax.random.split(key, 12)

    # Small shapes consistent with the module: batch=2, seq=8, dim=32,
    # heads=4, dim_head=64 (module-default head width).
    b, n, dim = 2, 8, 32
    heads, dim_head = 4, 64

    mod = AttentionQKV(dim, heads=heads, dim_head=dim_head, dropout=0.0,
                       key=keys[0])

    q = jax.random.normal(keys[1], (b, n, dim), jnp.float32)
    k = jax.random.normal(keys[2], (b, n, dim), jnp.float32)
    v = jax.random.normal(keys[3], (b, n, dim), jnp.float32)

    out = mod(q, k, v)
    jax.block_until_ready(out)
    assert out.shape == (b, n, dim)
    ref = _reference(mod, q, k, v)
    assert jnp.allclose(out, ref, atol=3e-2, rtol=3e-2), "self-attn mismatch"

    # Cross-attention: key/value sequence length differs from the query length.
    nk = 16
    kc = jax.random.normal(keys[4], (b, nk, dim), jnp.float32)
    vc = jax.random.normal(keys[5], (b, nk, dim), jnp.float32)
    out_c = mod(q, kc, vc)
    jax.block_until_ready(out_c)
    ref_c = _reference(mod, q, kc, vc)
    assert jnp.allclose(out_c, ref_c, atol=3e-2, rtol=3e-2), "cross-attn mismatch"

    # Tiled GEMM with several M/N/K blocks, checked against a bf16-operand
    # reference (the kernel intentionally rounds MXU operands to bf16).
    xl = jax.random.normal(keys[6], (64, 256), jnp.float32)
    wl = jax.random.normal(keys[7], (256, 256), jnp.float32) * 0.05
    bl = jax.random.normal(keys[8], (256,), jnp.float32) * 0.05
    out_l = linear(xl, wl, bl, tm_cap=32, tn_cap=128, tk_cap=128)
    jax.block_until_ready(out_l)
    ref_l = (xl.astype(jnp.bfloat16).astype(jnp.float32)
             @ wl.astype(jnp.bfloat16).astype(jnp.float32)) + bl
    assert jnp.allclose(out_l, ref_l, atol=2e-3, rtol=2e-3), "tiled linear mismatch"

    # Flash-attention path with several q/kv tiles (scale pre-folded into q).
    scale = dim_head ** -0.5
    qf = jax.random.normal(keys[9], (2, 32, 4, dim_head), jnp.float32)
    kf = jax.random.normal(keys[10], (2, 48, 4, dim_head), jnp.float32)
    vf = jax.random.normal(keys[11], (2, 48, 4, dim_head), jnp.float32)
    out_f = mha_core(qf * scale, kf, vf, tq_cap=16, tk_cap=16)
    jax.block_until_ready(out_f)
    ref_f = _sdpa_reference(qf, kf, vf, scale)
    assert jnp.allclose(out_f, ref_f, atol=3e-2, rtol=3e-2), "flash multi-tile mismatch"

    print("KERNEL_OK")
</pallas_src>

<mosaic_0001>
module attributes {stable_mosaic.version = 11 : i64} {
  func.func @_matmul_kernel(%arg0: i32, %arg1: i32, %arg2: i32, %arg3: memref<8x32xf32, #tpu.memory_space<vmem>>, %arg4: memref<32x256xbf16, #tpu.memory_space<vmem>>, %arg5: memref<8x256xbf16, #tpu.memory_space<vmem>>, %arg6: memref<8x256xf32, #tpu.memory_space<vmem>>) attributes {dimension_semantics = [#tpu.dimension_semantics<parallel>, #tpu.dimension_semantics<parallel>, #tpu.dimension_semantics<arbitrary>], iteration_bounds = array<i64: 2, 1, 1>, scalar_prefetch = 0 : i64, scratch_operands = 1 : i64, tpu.core_type = #tpu.core_type<tc>, window_params = [{transform_indices = @transform_0, window_bounds = array<i64: 8, 32>}, {transform_indices = @transform_1, window_bounds = array<i64: 32, 256>}, {transform_indices = @transform_2, window_bounds = array<i64: 8, 256>}]} {
    %c0_i32 = arith.constant 0 : i32
    %0 = arith.cmpi eq, %arg2, %c0_i32 : i32
    %1 = arith.extui %0 : i1 to i32
    %c0_i32_0 = arith.constant 0 : i32
    %2 = arith.cmpi ne, %1, %c0_i32_0 : i32
    scf.if %2 {
      %cst_10 = arith.constant 0.000000e+00 : f32
      %13 = vector.broadcast %cst_10 : f32 to vector<8x256xf32>
      %c0_11 = arith.constant 0 : index
      %c0_12 = arith.constant 0 : index
      %14 = vector.load %arg6[%c0_11, %c0_12] : memref<8x256xf32, #tpu.memory_space<vmem>>, vector<8x256xf32>
      tpu.vector_store %arg6[%c0_11, %c0_12], %13 {strides = array<i32>} : memref<8x256xf32, #tpu.memory_space<vmem>>, vector<8x256xf32>,
    } else {
    }
    %c0 = arith.constant 0 : index
    %c0_1 = arith.constant 0 : index
    %3 = vector.load %arg6[%c0, %c0_1] : memref<8x256xf32, #tpu.memory_space<vmem>>, vector<8x256xf32>
    %c0_2 = arith.constant 0 : index
    %c0_3 = arith.constant 0 : index
    %4 = vector.load %arg3[%c0_2, %c0_3] : memref<8x32xf32, #tpu.memory_space<vmem>>, vector<8x32xf32>
    %5 = arith.truncf %4 : vector<8x32xf32> to vector<8x32xbf16>
    %c0_4 = arith.constant 0 : index
    %c0_5 = arith.constant 0 : index
    %6 = vector.load %arg4[%c0_4, %c0_5] : memref<32x256xbf16, #tpu.memory_space<vmem>>, vector<32x256xbf16>
    %cst = arith.constant dense<0.000000e+00> : vector<8x256xf32>
    %7 = tpu.matmul %5, %6, %cst {dimension_numbers = #tpu.dot_dimension_numbers<[1], [0], [0], [1], [0, 0, 1, 1], [], []>} : vector<8x32xbf16>, vector<32x256xbf16>, vector<8x256xf32> -> vector<8x256xf32>
    %8 = arith.addf %3, %7 : vector<8x256xf32>
    %c0_6 = arith.constant 0 : index
    %c0_7 = arith.constant 0 : index
    %9 = vector.load %arg6[%c0_6, %c0_7] : memref<8x256xf32, #tpu.memory_space<vmem>>, vector<8x256xf32>
    tpu.vector_store %arg6[%c0_6, %c0_7], %8 {strides = array<i32>} : memref<8x256xf32, #tpu.memory_space<vmem>>, vector<8x256xf32>,
    %c0_i32_8 = arith.constant 0 : i32
    %10 = arith.cmpi eq, %arg2, %c0_i32_8 : i32
    %11 = arith.extui %10 : i1 to i32
    %c0_i32_9 = arith.constant 0 : i32
    %12 = arith.cmpi ne, %11, %c0_i32_9 : i32
    scf.if %12 {
      %c0_10 = arith.constant 0 : index
      %c0_11 = arith.constant 0 : index
      %13 = vector.load %arg6[%c0_10, %c0_11] : memref<8x256xf32, #tpu.memory_space<vmem>>, vector<8x256xf32>
      %14 = arith.truncf %13 : vector<8x256xf32> to vector<8x256xbf16>
      %c0_12 = arith.constant 0 : index
      %c0_13 = arith.constant 0 : index
      %15 = vector.load %arg5[%c0_12, %c0_13] : memref<8x256xbf16, #tpu.memory_space<vmem>>, vector<8x256xbf16>
      tpu.vector_store %arg5[%c0_12, %c0_13], %14 {strides = array<i32>} : memref<8x256xbf16, #tpu.memory_space<vmem>>, vector<8x256xbf16>,
    } else {
    }
    return
  }
  func.func @transform_0(%arg0: i32, %arg1: i32, %arg2: i32) -> (i32, i32) {
    %c0_i32 = arith.constant 0 : i32
    return %arg0, %arg2 : i32, i32
  }
  func.func @transform_1(%arg0: i32, %arg1: i32, %arg2: i32) -> (i32, i32) {
    %c0_i32 = arith.constant 0 : i32
    return %arg2, %arg1 : i32, i32
  }
  func.func @transform_2(%arg0: i32, %arg1: i32, %arg2: i32) -> (i32, i32) {
    %c0_i32 = arith.constant 0 : i32
    return %arg0, %arg1 : i32, i32
  }
}

</mosaic_0001>

<bundles_post_ra>
// kernel: tpu_custom_call.1
= control target key start
LH: loop header
LB: loop body
LE: loop exit
PB: predicated region body
PF: predicated region fallthrough
CT: control target
= control target key end

     0   :  { %7 = vsyncpa [#allocation4], 0  ;;  %s916_s0 = inlined_call_operand.hbm [shape: f32[16,32], index: 0, kind: input, shape index: {}]   ;;  %s917_s1 = inlined_call_operand.hbm [shape: bf16[32,256], index: 1, kind: input, shape index: {}]   ;;  %s918_s2 = inlined_call_operand.hbm [shape: bf16[16,256], index: 2, kind: output, shape index: {}]  }
   0x1   :  { %9 = vsyncpa [#allocation4 + $0x1], 0 }
   0x2   :  { %10 = vsyncpa [#allocation7], 0 }
   0x3   :  { %11 = vsyncpa [#allocation5], 0 }
   0x4   :  { %13 = vsyncpa [#allocation5 + $0x1], 0  ;;  %s702_s9 = smov 0   ;;  %s704_s10 = smov 0  }
   0x5   :  { %s706_s11 = smov 0   ;;  %s708_s12 = smov 0  }
   0x6   :  { %s710_s13 = smov 0   ;;  %s712_s14 = smov 0  }
   0x7 LB: > { %s429_s15 = sadd.s32 4294967295, %s679_s14   ;;  %s430_s16 = sadd.s32 4294967294, %s679_s14   ;;  %s679_s14 = sphi %s712_s14, %s19_s14   ;;  %s675_s13 = sphi %s710_s13, %s942_s13   ;;  %s671_s12 = sphi %s708_s12, %s941_s12   ;;  %s667_s11 = sphi %s706_s11, %s940_s11   ;;  %s663_s10 = sphi %s704_s10, %s939_s10   ;;  %s659_s9 = sphi %s702_s9, %s938_s9  }
   0x8   : > { %p60_p0 = scmp.ne.s32.totalorder %s663_s10, %s659_s9  ;;  %p736_p1 = scmp.eq.s32.totalorder %s429_s15, 0 }
   0x9   : > { %p740_p2 = scmp.eq.s32.totalorder %s429_s15, 1  ;;  %p120_p3 = scmp.eq.s32.totalorder %s430_s16, 1 }
   0xa   : > { %s923_s17 = scalar_select %p736_p1, 1, 0 }
   0xb   : > { %s924_s18 = scalar_select %p740_p2, 1, 0 }
   0xc   : > { %p746_p4 = por %p736_p1, %p60_p0  ;;  %p431_p5 = scmp.ge.s32.totalorder %s679_s14, 1 }
   0xd   : > { %p751_p6 = por %p120_p3, %p60_p0  ;;  %p127_p7 = scmp.lt.s32.totalorder %s679_s14, 3 }
   0xe   : > { %s925_s19 = scalar_select %p746_p4, 1, 0 }
   0xf   : > { %s926_s20 = scalar_select %p751_p6, 1, 0 }
  0x10   : > { %p756_p8 = pnand %p431_p5, %p127_p7  ;;  %s681_s22 = smov [#allocation6]  }
  0x11   : > { %s145_s23 = sshll.u32 %s681_s22, 4  ;;  %s38_s25 = sadd.s32 1, %s675_s13  ;;  %s146_s23 = int_to_ptr.vmem [resolvable:$true] %s145_s23 }
  0x12   : > { %s927_s21 = scalar_select %p756_p8, 1, 0 }
  0x13   : > { %p461_p9 = pneg %p756_p8  ;;  %s535_s28 = scalar_lea.hbm %s917_s1, 512 }
  0x14   : > { %p536_p12 = scmp.ne.s32.totalorder %s917_s1, %s535_s28  ;;  %p542_p5 = scmp.lt.u32.totalorder %s535_s28, %s917_s1 }
  0x15   : > { %p765_p11 = pnand %p461_p9, %p736_p1 }
  0x17   : > { %p537_p13 = pneg %p765_p11 }
  0x19   : > { %p538_p0 = pnand %p537_p13, %p536_p12 }
  0x1b   : > { %p539_p3 = pneg %p538_p0 }
  0x1d   : > { %p544_p7 = pnand %p542_p5, %p539_p3 }
  0x1f   : > { %547 = shalt.err (!%p544_p7)
}
  0x20   : > { %s548_s5 = scalar_lea.vmem %s146_s23, 512  ;;  %p556_p1 = scmp.lt.s32.totalorder %s146_s23, %s146_s23 }
  0x21   : > { %p549_p9 = scmp.ne.s32.totalorder %s146_s23, %s548_s5  ;;  %p557_p4 = scmp.lt.s32.totalorder %s548_s5, %s548_s5 }
  0x23   : > { %p551_p10 = pnand %p549_p9, %p537_p13  ;;  %p558_p8 = por %p557_p4, %p556_p1 }
  0x25   : > { %p552_p6 = pneg %p551_p10 }
  0x27   : > { %p559_p2 = pnand %p558_p8, %p552_p6 }
  0x29   : > { %562 = shalt.err (!%p559_p2)
}
  0x2a   : > { %s682_s6 = smov 128   ;;  %s683_s7 = smov 8  }
  0x2b   : > { %464 = dma.hbm_to_vmem [thread:$0]  (!%p765_p11), %s917_s1, 512, %s146_s23, [#allocation7], %s682_s6, %s682_s6, %s683_s7  }
  0x2c   : > { %p40_p1 = scmp.ge.s32.totalorder %s38_s25, 2  ;;  %s47_s16 = sadd.s32 1, %s667_s11 }
  0x2d   : > { %p54_p2 = scmp.ne.s32.totalorder %s667_s11, %s663_s10  ;;  %p55_p4 = scmp.eq.s32.totalorder %s679_s14, 0 }
  0x2e   : > { %s944_s25 = smov (%p40_p1, %s38_s25), 0  ;;  %p930_p8 = scmp.ne.s32.totalorder %s924_s18, 0 }
  0x2f   : > { %p792_p6 = por %p55_p4, %p54_p2  ;;  %s42_s24 = ssub.s32 %s675_s13, %s944_s25 }
  0x30   : > { %p798_p10 = por %p930_p8, %p54_p2  ;;  %p474_p12 = scmp.lt.s32.totalorder %s679_s14, 2 }
  0x31   : > { %p45_p11 = scmp.eq.s32.totalorder %s42_s24, 0  ;;  %s159_s23 = sand.u32 1, %s667_s11  }
  0x32   : > { %s434_s27 = sshll.u32 %s159_s23, 3  ;;  %s435_s29 = sshll.u32 %s675_s13, 7 }
  0x33   : > { %s807_s28 = scalar_select %p45_p11, %s667_s11, %s47_s16  }
  0x34   : > { %s813_s4 = scalar_lea.hbm %s916_s0, %s435_s29  ;;  %s163_s18 = scalar_lea.vmem [#allocation3], %s434_s27 }
  0x35   : > { %s171_s5 = sshll.u32 %s163_s18, 4  ;;  %p819_p13 = pnand %p474_p12, %p792_p6  ;;  %s815_s5 = int_to_ptr.vmem [resolvable:$true] %s171_s5 }
  0x36   : > { %s160_s7 = scalar_lea.sflag [#allocation4], %s159_s23  ;;  %s563_s8 = scalar_lea.hbm %s813_s4, 128 }
  0x37   : > { %p564_p0 = scmp.ne.s32.totalorder %s813_s4, %s563_s8  ;;  %p565_p3 = pneg %p819_p13 }
  0x38   : > { %s568_s24 = scalar_lea.hbm %s916_s0, 256  ;;  %p569_p9 = scmp.lt.u32.totalorder %s813_s4, %s916_s0 }
  0x39   : > { %p566_p5 = pnand %p565_p3, %p564_p0  ;;  %p570_p1 = scmp.lt.u32.totalorder %s568_s24, %s563_s8 }
  0x3a   : > { %p572_p4 = scmp.lt.u32.totalorder %s563_s8, %s813_s4 }
  0x3b   : > { %p567_p7 = pneg %p566_p5  ;;  %p571_p2 = por %p570_p1, %p569_p9 }
  0x3d   : > { %p573_p6 = por %p572_p4, %p571_p2 }
  0x3f   : > { %p574_p8 = pnand %p573_p6, %p567_p7 }
  0x41   : > { %577 = shalt.err (!%p574_p8)
}
  0x42   : > { %s578_s23 = scalar_lea.vmem %s815_s5, 128  ;;  %s684_s29 = smov [#allocation3]  }
  0x43   : > { %p579_p12 = scmp.ne.s32.totalorder %s815_s5, %s578_s23  ;;  %s583_s30 = sshll.u32 %s684_s29, 4  ;;  %s584_s30 = int_to_ptr.vmem [resolvable:$false] %s583_s30 }
  0x44   : > { %s585_s3 = scalar_lea.vmem %s584_s30, 256  ;;  %p586_p5 = scmp.lt.s32.totalorder %s815_s5, %s584_s30 }
  0x45   : > { %p581_p11 = pnand %p579_p12, %p565_p3  ;;  %p587_p9 = scmp.lt.s32.totalorder %s585_s3, %s578_s23 }
  0x47   : > { %p582_p0 = pneg %p581_p11  ;;  %p588_p1 = por %p587_p9, %p586_p5 }
  0x49   : > { %p589_p2 = pnand %p588_p1, %p582_p0 }
  0x4b   : > { %592 = shalt.err (!%p589_p2)
}
  0x4c   : > { %468 = dma.hbm_to_vmem [thread:$0]  (!%p819_p13), %s813_s4, 128, %s815_s5, %s160_s7  }
  0x4d   : > { %p933_p7 = scmp.ne.s32.totalorder %s927_s21, 0 }
  0x4e   : > { %s851_s18 = sand.u32 (!%p933_p7), 1, %s663_s10   ;;  %p934_p3 = scmp.ne.s32.totalorder (!%p933_p7), %s925_s19, 0 }
  0x4f   : > { %180 = sbr.rel (%p933_p7) target bundleno = 328 (0x148), region = 28  ;;  %s437_s8 = sshll.u32 (!%p933_p7), %s851_s18, 3 }
  0x50   : > { %s183_s15 = scalar_lea.sflag (!%p933_p7), [#allocation4], %s851_s18  ;;  %s186_s16 = scalar_lea.vmem (!%p933_p7), [#allocation3], %s437_s8 }
  0x56   : > { %646 = dma.done.wait (%p934_p3), %s183_s15, 128  }
  0x57   : > { %648 = vsyncadd (%p934_p3), %s183_s15, 4294967168  ;;  %p935_p4 = scmp.ne.s32.totalorder %s923_s17, 0 }
  0x59   : > { %650 = dma.done.wait (%p935_p4), [#allocation7], 512  }
  0x5a   : > { %652 = vsyncadd (%p935_p4), [#allocation7], 4294966784  ;;  %v685_v0 = vmov 0   ;;  %v529_v1 = vld [vmem:[#allocation6 + $0x4] ss:$8 sps:$4 sm:$0xff]   ;;  %v223_v5 = vld [vmem:[%s186_s16] sm:$0xff] }
  0x5b   : > { %285 = vmatprep.mubr.bf16.mxu0 %v685_v0  ;;  %v531_v2 = vld [vmem:[#allocation6] ss:$8 sps:$4 sm:$0xff]   ;;  %253 = vmatprep.subr.bf16.mxu0 %v529_v1  ;;  %v532_v3 = vld [vmem:[#allocation6 + $0x14] ss:$8 sps:$4 sm:$0xff]   ;;  %v534_v4 = vld [vmem:[#allocation6 + $0x10] ss:$8 sps:$4 sm:$0xff]   ;;  %v224_v6 = vpack.c.bf16 %v223_v5, %v223_v5 }
  0x5c   : > { %254 = vmatpush1.bf16.msra.mxu0 %v531_v2  ;;  %vm249_vm0 = vcmask 261120   ;;  %s452_s19 = sshll.u32 %s671_s12, 7  ;;  %s210_s17 = scalar_lea.vmem [#allocation8], %s437_s8 }
  0x5d   : > { %255 = vmatprep.subr.bf16.mxu0 %v532_v3  ;;  %s329_s21 = sshll.u32 %s210_s17, 4  ;;  %s867_s6 = scalar_lea.hbm %s918_s2, %s452_s19  ;;  %s869_s21 = int_to_ptr.vmem [resolvable:$true] %s329_s21 }
  0x5e   : > { %s313_s7 = scalar_lea.sflag [#allocation5], %s851_s18  ;;  %s593_s12 = scalar_lea.vmem %s869_s21, 128 }
  0x5f   : > { %p594_p13 = scmp.ne.s32.totalorder %s869_s21, %s593_s12  ;;  %s686_s24 = smov [#allocation8]  }
  0x60   : > { %256 = vmatpush1.bf16.msra.mxu0 %v534_v4  ;;  %s597_s22 = sshll.u32 %s686_s24, 4  ;;  %s598_s22 = int_to_ptr.vmem [resolvable:$false] %s597_s22 }
  0x61   : > { %p595_p6 = pnand %p594_p13, %p798_p10  ;;  %s599_s27 = scalar_lea.vmem %s598_s22, 256 }
  0x62   : > { %p600_p12 = scmp.lt.s32.totalorder %s869_s21, %s598_s22  ;;  %p601_p11 = scmp.lt.s32.totalorder %s599_s27, %s593_s12 }
  0x63   : > { %444 = vmatmul.mubr.msk.bf16.vlgmr.msra.gmra.mrb[0].mxu0 %vm249_vm0, %v224_v6  ;;  %p596_p8 = pneg %p595_p6 }
  0x64   : > { %p602_p0 = por %p601_p11, %p600_p12 }
  0x66   : > { %p603_p5 = pnand %p602_p0, %p596_p8 }
 0x136   : > { %v287_v7 = vpop.f32.mrb[0].mxu0 }
 0x137   : > { %v289_v8 = vpop.f32.mrb[1].mxu0 }
 0x138   : > { %v451_v9 = vpack.c.bf16 %v289_v8, %v287_v7  ;;  %v291_v10 = vpop.f32.mrb[2].mxu0 }
 0x139   : > { %v292_v11 = vpop.f32.mrb[3].mxu0 }
 0x13a   : > { %311 = vst [vmem:[%s210_s17] sm:$0xff] %v451_v9 }
 0x13b   : > { %606 = shalt.err (!%p603_p5)
}
 0x13c   : > { %s607_s23 = scalar_lea.hbm %s867_s6, 128  ;;  %s611_s3 = scalar_lea.hbm %s918_s2, 256 }
 0x13d   : > { %p608_p9 = scmp.ne.s32.totalorder %s867_s6, %s607_s23  ;;  %p612_p7 = scmp.lt.u32.totalorder %s867_s6, %s918_s2 }
 0x13e   : > { %p613_p3 = scmp.lt.u32.totalorder %s611_s3, %s607_s23  ;;  %p615_p13 = scmp.lt.u32.totalorder %s607_s23, %s867_s6 }
 0x13f   : > { %p609_p1 = pnand %p608_p9, %p798_p10 }
 0x140   : > { %p614_p4 = por %p613_p3, %p612_p7 }
 0x141   : > { %p610_p2 = pneg %p609_p1 }
 0x142   : > { %p616_p6 = por %p615_p13, %p614_p4 }
 0x144   : > { %p617_p8 = pnand %p616_p6, %p610_p2 }
 0x146   : > { %620 = shalt.err (!%p617_p8)
}
 0x147   : > { %459 = dma.vmem_to_hbm [thread:$0]  (%p798_p10), %s869_s21, 128, %s867_s6, %s313_s7  }
 0x148 PF: > { %s341_s15 = sand.u32 1, %s659_s9   ;;  %p936_p12 = scmp.ne.s32.totalorder %s926_s20, 0 }
 0x149   : > { %p937_p11 = scmp.ge.s32.totalorder %s679_s14, 2  ;;  %s342_s16 = scalar_lea.sflag [#allocation5], %s341_s15 }
 0x14b   : > { %p470_p0 = pnand %p937_p11, %p936_p12 }
 0x14d   : > { %654 = dma.done.wait (!%p470_p0), %s342_s16, 128  }
 0x14e   : > { %656 = vsyncadd (!%p470_p0), %s342_s16, 4294967168  ;;  %s19_s14 = sadd.s32 1, %s679_s14   ;;  %s938_s9 = smov %s663_s10 }
 0x14f   : > { %p16_p5 = scmp.ge.s32.totalorder %s19_s14, 4   ;;  %s939_s10 = smov %s667_s11 }
 0x150   : > { %s940_s11 = smov %s807_s28  ;;  %s941_s12 = smov %s675_s13 }
 0x151   : > { %s942_s13 = smov %s944_s25  ;;  %18 = sbr.rel (!%p16_p5) target bundleno = 7 (0x7), region = 86 }
 0x158   :  { %347 = vsyncpa [#allocation4], 1 }
 0x159   :  { %349 = vsyncpa [#allocation4 + $0x1], 1 }
 0x15a   :  { %350 = vsyncpa [#allocation7], 1 }
 0x15b   :  { %351 = vsyncpa [#allocation5], 1 }
 0x15c   :  { %353 = vsyncpa [#allocation5 + $0x1], 1 }

</bundles_post_ra>
